<compile_context>
chip_gen: v6e
topology: v6e:2x2x1
jax: 0.10.0
libtpu: 0.0.40
codegen_flags: <defaults>
</compile_context>

<pallas_src>
import jax
import jax.numpy as jnp
from jax.experimental import pallas as pl
from jax.experimental.pallas import tpu as pltpu

# ---- model hyper-parameters (consistent with the PyTorch forward) -----------
GLOVE_DIM = 100                  # per-token embedding dim (GloVe 6B.100d)
CONTEXT = 4                      # forward does .view(-1, 4 * 100)
EMBED_DIM = CONTEXT * GLOVE_DIM  # 400 -> logical input dim of hidden_layer1
HIDDEN_DIM = 32
VOCAB_SIZE = 64                  # synthetic vocab (GloVe/tokenizer not available)
VOCAB_PAD = 128                  # lane-dense logits width inside the kernel
ONEHOT_DIM = CONTEXT * VOCAB_SIZE  # 256: combined one-hot width (lane aligned)
BATCH = 8
MAX_BATCH_TILE = 256             # batch tile when B grows (v6e/v7x MXU width)


def _lm_kernel(ids_ref, ew1_ref, b1_ref, w2_ref, b2_ref, w3_ref, b3_ref, o_ref):
    """Fused forward: gather+layer1 (one combined one-hot matmul) -> tanh ->
    relu(layer2) -> layer3 (lane-dense padded logits)."""
    ids = ids_ref[...]                       # (BT, CONTEXT) int32
    bt = ids.shape[0]

    # Combined one-hot over (context slot, vocab id): lane c*V + ids[:, c] is 1.
    lane = jax.lax.broadcasted_iota(jnp.int32, (bt, ONEHOT_DIM), 1)
    onehot = jnp.zeros((bt, ONEHOT_DIM), jnp.float32)
    for c in range(CONTEXT):                 # unrolled at trace time (4 cmps)
        onehot = onehot + (lane == (ids[:, c:c + 1] + c * VOCAB_SIZE)).astype(
            jnp.float32)

    # Embedding gather + hidden_layer1 in one MXU matmul against the folded
    # (CONTEXT*VOCAB, HIDDEN) table, then tanh.
    h1 = jnp.tanh(
        jnp.dot(onehot, ew1_ref[...], preferred_element_type=jnp.float32)
        + b1_ref[...])
    h2 = jnp.maximum(
        jnp.dot(h1, w2_ref[...], preferred_element_type=jnp.float32)
        + b2_ref[...],
        0.0)
    # Lane-dense (BT, 128) store; padded logit columns have exactly-zero weights.
    o_ref[...] = (
        jnp.dot(h2, w3_ref[...], preferred_element_type=jnp.float32)
        + b3_ref[...])


def pack_params(params):
    """Pre-pack the logical (PyTorch-shaped, transposed) params for the kernel."""
    emb, w1, b1, w2, b2, w3, b3 = params
    # Fold layer-1 into the embedding table per context slot (exact
    # re-association):
    #   x @ W1 = sum_c emb[ids[:, c]] @ W1_c = sum_c onehot_c @ (emb @ W1_c)
    w1_chunks = w1.reshape(CONTEXT, GLOVE_DIM, HIDDEN_DIM)        # (4, 100, 32)
    emb_w1 = jnp.einsum('vd,cdh->cvh', emb, w1_chunks)            # (4, 64, 32)
    emb_w1 = emb_w1.reshape(ONEHOT_DIM, HIDDEN_DIM)               # (256, 32)
    # W3/b3: pad vocab 64 -> 128 lanes with zeros (lane-dense output store).
    w3_pad = jnp.zeros((HIDDEN_DIM, VOCAB_PAD), jnp.float32)
    w3_pad = w3_pad.at[:, :VOCAB_SIZE].set(w3)
    b3_pad = jnp.zeros((1, VOCAB_PAD), jnp.float32)
    b3_pad = b3_pad.at[:, :VOCAB_SIZE].set(b3)
    return (emb_w1, b1, w2, b2, w3_pad, b3_pad)


def language_model_forward(input_seq, packed_params):
    """input_seq: int32 (B, CONTEXT) token ids; returns f32 (B, VOCAB_SIZE)."""
    emb_w1, b1, w2, b2, w3_pad, b3_pad = packed_params
    ids = input_seq.astype(jnp.int32)
    B = ids.shape[0]

    bt = B if B <= MAX_BATCH_TILE else MAX_BATCH_TILE
    assert B % bt == 0, "batch must be a multiple of the batch tile"
    grid = (B // bt,)

    const = lambda shape: pl.BlockSpec(shape, lambda i: (0,) * len(shape))

    out_pad = pl.pallas_call(
        _lm_kernel,
        out_shape=jax.ShapeDtypeStruct((B, VOCAB_PAD), jnp.float32),
        grid=grid,
        in_specs=[
            pl.BlockSpec((bt, CONTEXT), lambda i: (i, 0)),   # token ids
            const((ONEHOT_DIM, HIDDEN_DIM)),                 # folded emb @ W1
            const((1, HIDDEN_DIM)),                          # b1
            const((HIDDEN_DIM, HIDDEN_DIM)),                 # W2
            const((1, HIDDEN_DIM)),                          # b2
            const((HIDDEN_DIM, VOCAB_PAD)),                  # W3 (padded)
            const((1, VOCAB_PAD)),                           # b3 (padded)
        ],
        out_specs=pl.BlockSpec((bt, VOCAB_PAD), lambda i: (i, 0)),
        compiler_params=pltpu.CompilerParams(
            dimension_semantics=("parallel",)),              # batch axis
    )(ids, emb_w1, b1, w2, b2, w3_pad, b3_pad)

    return out_pad[:, :VOCAB_SIZE]


def init_params(key):
    """Deterministic synthetic parameters with the shapes implied by __init__."""
    k = jax.random.split(key, 7)
    # TODO(synk): the real model loads GloVe vectors / builds a corpus vocab; a
    # random embedding table of the same shape is used here instead.
    emb_matrix = jax.random.normal(k[0], (VOCAB_SIZE, GLOVE_DIM), jnp.float32)

    # nn.Linear(in, out): weight (out, in), bias (out,). Stored transposed (in, out).
    def linear(kw, kb, fan_in, fan_out):
        bound = 1.0 / jnp.sqrt(fan_in)
        w = jax.random.uniform(kw, (fan_in, fan_out), jnp.float32, -bound, bound)
        b = jax.random.uniform(kb, (1, fan_out), jnp.float32, -bound, bound)
        return w, b

    w1, b1 = linear(k[1], k[2], EMBED_DIM, HIDDEN_DIM)
    w2, b2 = linear(k[3], k[4], HIDDEN_DIM, HIDDEN_DIM)
    w3, b3 = linear(k[5], k[6], HIDDEN_DIM, VOCAB_SIZE)
    return (emb_matrix, w1, b1, w2, b2, w3, b3)


def reference_forward(input_seq, params):
    """Pure-JAX reference of the PyTorch forward (for a sanity check)."""
    emb_matrix, w1, b1, w2, b2, w3, b3 = params
    x = jnp.take(emb_matrix, input_seq, axis=0).reshape(-1, EMBED_DIM)
    h1 = jnp.tanh(x @ w1 + b1)
    h2 = jax.nn.relu(h1 @ w2 + b2)
    return h2 @ w3 + b3


if __name__ == "__main__":
    key = jax.random.PRNGKey(0)
    pkey, dkey = jax.random.split(key)
    params = init_params(pkey)
    packed = pack_params(params)

    input_seq = jax.random.randint(
        dkey, (BATCH, CONTEXT), minval=0, maxval=VOCAB_SIZE, dtype=jnp.int32
    )

    out = language_model_forward(input_seq, packed)
    out = jax.block_until_ready(out)

    ref = reference_forward(input_seq, params)
    assert out.shape == (BATCH, VOCAB_SIZE)
    assert jnp.allclose(out, ref, atol=1e-3, rtol=1e-3), (
        float(jnp.max(jnp.abs(out - ref))))

    print("KERNEL_OK")
</pallas_src>

<mosaic_0001>
module attributes {stable_mosaic.version = 11 : i64} {
  func.func @_lm_kernel(%arg0: i32, %arg1: memref<8x4xi32, #tpu.memory_space<vmem>>, %arg2: memref<256x32xf32, #tpu.memory_space<vmem>>, %arg3: memref<1x32xf32, #tpu.memory_space<vmem>>, %arg4: memref<32x32xf32, #tpu.memory_space<vmem>>, %arg5: memref<1x32xf32, #tpu.memory_space<vmem>>, %arg6: memref<32x128xf32, #tpu.memory_space<vmem>>, %arg7: memref<1x128xf32, #tpu.memory_space<vmem>>, %arg8: memref<8x128xf32, #tpu.memory_space<vmem>>) attributes {dimension_semantics = [#tpu.dimension_semantics<parallel>], iteration_bounds = array<i64: 1>, scalar_prefetch = 0 : i64, scratch_operands = 0 : i64, tpu.core_type = #tpu.core_type<tc>, window_params = [{transform_indices = @transform_0, window_bounds = array<i64: 8, 4>}, {pipeline_mode = #tpu.pipeline_mode<synchronous>, transform_indices = @transform_1, window_bounds = array<i64: 256, 32>}, {pipeline_mode = #tpu.pipeline_mode<synchronous>, transform_indices = @transform_2, window_bounds = array<i64: 1, 32>}, {pipeline_mode = #tpu.pipeline_mode<synchronous>, transform_indices = @transform_3, window_bounds = array<i64: 32, 32>}, {pipeline_mode = #tpu.pipeline_mode<synchronous>, transform_indices = @transform_4, window_bounds = array<i64: 1, 32>}, {pipeline_mode = #tpu.pipeline_mode<synchronous>, transform_indices = @transform_5, window_bounds = array<i64: 32, 128>}, {pipeline_mode = #tpu.pipeline_mode<synchronous>, transform_indices = @transform_6, window_bounds = array<i64: 1, 128>}, {transform_indices = @transform_7, window_bounds = array<i64: 8, 128>}]} {
    %c0 = arith.constant 0 : index
    %c0_0 = arith.constant 0 : index
    %0 = vector.load %arg1[%c0, %c0_0] : memref<8x4xi32, #tpu.memory_space<vmem>>, vector<8x4xi32>
    %1 = tpu.iota {dimensions = array<i32: 1>} : vector<8x256xi32>
    %cst = arith.constant 0.000000e+00 : f32
    %2 = vector.broadcast %cst : f32 to vector<8x256xf32>
    %3 = vector.extract_strided_slice %0 {offsets = [0, 0], sizes = [8, 1], strides = [1, 1]} : vector<8x4xi32> to vector<8x1xi32>
    %c0_i32 = arith.constant 0 : i32
    %4 = vector.broadcast %c0_i32 : i32 to vector<8x1xi32>
    %5 = arith.addi %3, %4 : vector<8x1xi32>
    %6 = vector.broadcast %5 : vector<8x1xi32> to vector<8x256xi32>
    %7 = arith.cmpi eq, %1, %6 : vector<8x256xi32>
    %8 = arith.extui %7 : vector<8x256xi1> to vector<8x256xi32>
    %9 = arith.sitofp %8 : vector<8x256xi32> to vector<8x256xf32>
    %10 = arith.addf %2, %9 : vector<8x256xf32>
    %11 = vector.extract_strided_slice %0 {offsets = [0, 1], sizes = [8, 1], strides = [1, 1]} : vector<8x4xi32> to vector<8x1xi32>
    %c64_i32 = arith.constant 64 : i32
    %12 = vector.broadcast %c64_i32 : i32 to vector<8x1xi32>
    %13 = arith.addi %11, %12 : vector<8x1xi32>
    %14 = vector.broadcast %13 : vector<8x1xi32> to vector<8x256xi32>
    %15 = arith.cmpi eq, %1, %14 : vector<8x256xi32>
    %16 = arith.extui %15 : vector<8x256xi1> to vector<8x256xi32>
    %17 = arith.sitofp %16 : vector<8x256xi32> to vector<8x256xf32>
    %18 = arith.addf %10, %17 : vector<8x256xf32>
    %19 = vector.extract_strided_slice %0 {offsets = [0, 2], sizes = [8, 1], strides = [1, 1]} : vector<8x4xi32> to vector<8x1xi32>
    %c128_i32 = arith.constant 128 : i32
    %20 = vector.broadcast %c128_i32 : i32 to vector<8x1xi32>
    %21 = arith.addi %19, %20 : vector<8x1xi32>
    %22 = vector.broadcast %21 : vector<8x1xi32> to vector<8x256xi32>
    %23 = arith.cmpi eq, %1, %22 : vector<8x256xi32>
    %24 = arith.extui %23 : vector<8x256xi1> to vector<8x256xi32>
    %25 = arith.sitofp %24 : vector<8x256xi32> to vector<8x256xf32>
    %26 = arith.addf %18, %25 : vector<8x256xf32>
    %27 = vector.extract_strided_slice %0 {offsets = [0, 3], sizes = [8, 1], strides = [1, 1]} : vector<8x4xi32> to vector<8x1xi32>
    %c192_i32 = arith.constant 192 : i32
    %28 = vector.broadcast %c192_i32 : i32 to vector<8x1xi32>
    %29 = arith.addi %27, %28 : vector<8x1xi32>
    %30 = vector.broadcast %29 : vector<8x1xi32> to vector<8x256xi32>
    %31 = arith.cmpi eq, %1, %30 : vector<8x256xi32>
    %32 = arith.extui %31 : vector<8x256xi1> to vector<8x256xi32>
    %33 = arith.sitofp %32 : vector<8x256xi32> to vector<8x256xf32>
    %34 = arith.addf %26, %33 : vector<8x256xf32>
    %c0_1 = arith.constant 0 : index
    %c0_2 = arith.constant 0 : index
    %35 = vector.load %arg2[%c0_1, %c0_2] : memref<256x32xf32, #tpu.memory_space<vmem>>, vector<256x32xf32>
    %cst_3 = arith.constant dense<0.000000e+00> : vector<8x32xf32>
    %36 = tpu.matmul %34, %35, %cst_3 {dimension_numbers = #tpu.dot_dimension_numbers<[1], [0], [0], [1], [0, 0, 1, 1], [], []>} : vector<8x256xf32>, vector<256x32xf32>, vector<8x32xf32> -> vector<8x32xf32>
    %c0_4 = arith.constant 0 : index
    %c0_5 = arith.constant 0 : index
    %37 = vector.load %arg3[%c0_4, %c0_5] : memref<1x32xf32, #tpu.memory_space<vmem>>, vector<1x32xf32>
    %38 = vector.broadcast %37 : vector<1x32xf32> to vector<8x32xf32>
    %39 = arith.addf %36, %38 : vector<8x32xf32>
    %40 = math.tanh %39 : vector<8x32xf32>
    %c0_6 = arith.constant 0 : index
    %c0_7 = arith.constant 0 : index
    %41 = vector.load %arg4[%c0_6, %c0_7] : memref<32x32xf32, #tpu.memory_space<vmem>>, vector<32x32xf32>
    %cst_8 = arith.constant dense<0.000000e+00> : vector<8x32xf32>
    %42 = tpu.matmul %40, %41, %cst_8 {dimension_numbers = #tpu.dot_dimension_numbers<[1], [0], [0], [1], [0, 0, 1, 1], [], []>} : vector<8x32xf32>, vector<32x32xf32>, vector<8x32xf32> -> vector<8x32xf32>
    %c0_9 = arith.constant 0 : index
    %c0_10 = arith.constant 0 : index
    %43 = vector.load %arg5[%c0_9, %c0_10] : memref<1x32xf32, #tpu.memory_space<vmem>>, vector<1x32xf32>
    %44 = vector.broadcast %43 : vector<1x32xf32> to vector<8x32xf32>
    %45 = arith.addf %42, %44 : vector<8x32xf32>
    %cst_11 = arith.constant 0.000000e+00 : f32
    %46 = vector.broadcast %cst_11 : f32 to vector<8x32xf32>
    %47 = arith.maximumf %45, %46 : vector<8x32xf32>
    %c0_12 = arith.constant 0 : index
    %c0_13 = arith.constant 0 : index
    %48 = vector.load %arg6[%c0_12, %c0_13] : memref<32x128xf32, #tpu.memory_space<vmem>>, vector<32x128xf32>
    %cst_14 = arith.constant dense<0.000000e+00> : vector<8x128xf32>
    %49 = tpu.matmul %47, %48, %cst_14 {dimension_numbers = #tpu.dot_dimension_numbers<[1], [0], [0], [1], [0, 0, 1, 1], [], []>} : vector<8x32xf32>, vector<32x128xf32>, vector<8x128xf32> -> vector<8x128xf32>
    %c0_15 = arith.constant 0 : index
    %c0_16 = arith.constant 0 : index
    %50 = vector.load %arg7[%c0_15, %c0_16] : memref<1x128xf32, #tpu.memory_space<vmem>>, vector<1x128xf32>
    %51 = vector.broadcast %50 : vector<1x128xf32> to vector<8x128xf32>
    %52 = arith.addf %49, %51 : vector<8x128xf32>
    %c0_17 = arith.constant 0 : index
    %c0_18 = arith.constant 0 : index
    %53 = vector.load %arg8[%c0_17, %c0_18] : memref<8x128xf32, #tpu.memory_space<vmem>>, vector<8x128xf32>
    tpu.vector_store %arg8[%c0_17, %c0_18], %52 {strides = array<i32>} : memref<8x128xf32, #tpu.memory_space<vmem>>, vector<8x128xf32>,
    return
  }
  func.func @transform_0(%arg0: i32) -> (i32, i32) {
    %c0_i32 = arith.constant 0 : i32
    %c0_i32_0 = arith.constant 0 : i32
    return %arg0, %c0_i32 : i32, i32
  }
  func.func @transform_1(%arg0: i32) -> (i32, i32) {
    %c0_i32 = arith.constant 0 : i32
    %c0_i32_0 = arith.constant 0 : i32
    %c0_i32_1 = arith.constant 0 : i32
    return %c0_i32, %c0_i32_0 : i32, i32
  }
  func.func @transform_2(%arg0: i32) -> (i32, i32) {
    %c0_i32 = arith.constant 0 : i32
    %c0_i32_0 = arith.constant 0 : i32
    %c0_i32_1 = arith.constant 0 : i32
    return %c0_i32, %c0_i32_0 : i32, i32
  }
  func.func @transform_3(%arg0: i32) -> (i32, i32) {
    %c0_i32 = arith.constant 0 : i32
    %c0_i32_0 = arith.constant 0 : i32
    %c0_i32_1 = arith.constant 0 : i32
    return %c0_i32, %c0_i32_0 : i32, i32
  }
  func.func @transform_4(%arg0: i32) -> (i32, i32) {
    %c0_i32 = arith.constant 0 : i32
    %c0_i32_0 = arith.constant 0 : i32
    %c0_i32_1 = arith.constant 0 : i32
    return %c0_i32, %c0_i32_0 : i32, i32
  }
  func.func @transform_5(%arg0: i32) -> (i32, i32) {
    %c0_i32 = arith.constant 0 : i32
    %c0_i32_0 = arith.constant 0 : i32
    %c0_i32_1 = arith.constant 0 : i32
    return %c0_i32, %c0_i32_0 : i32, i32
  }
  func.func @transform_6(%arg0: i32) -> (i32, i32) {
    %c0_i32 = arith.constant 0 : i32
    %c0_i32_0 = arith.constant 0 : i32
    %c0_i32_1 = arith.constant 0 : i32
    return %c0_i32, %c0_i32_0 : i32, i32
  }
  func.func @transform_7(%arg0: i32) -> (i32, i32) {
    %c0_i32 = arith.constant 0 : i32
    %c0_i32_0 = arith.constant 0 : i32
    return %arg0, %c0_i32 : i32, i32
  }
}

</mosaic_0001>

<bundles_post_ra>
// kernel: tpu_custom_call.1
= control target key start
LH: loop header
LB: loop body
LE: loop exit
PB: predicated region body
PF: predicated region fallthrough
CT: control target
= control target key end

     0   :  { %v489_v2 = vmov 0   ;;  %v490_v3 = vmov 2   ;;  %v491_v11 = vmov 0.0   ;;  %v492_v13 = vmov 1   ;;  %s693_s0 = inlined_call_operand.vmem [shape: s32[8,4], index: 0, kind: input, shape index: {}]   ;;  %s694_s1 = inlined_call_operand.vmem [shape: f32[256,32], index: 1, kind: input, shape index: {}]   ;;  %s695_s2 = inlined_call_operand.vmem [shape: f32[1,32], index: 2, kind: input, shape index: {}]   ;;  %s696_s3 = inlined_call_operand.vmem [shape: f32[32,32], index: 3, kind: input, shape index: {}]   ;;  %s697_s4 = inlined_call_operand.vmem [shape: f32[1,32], index: 4, kind: input, shape index: {}]   ;;  %s698_s5 = inlined_call_operand.vmem [shape: f32[32,128], index: 5, kind: input, shape index: {}]   ;;  %s699_s6 = inlined_call_operand.vmem [shape: f32[1,128], index: 6, kind: input, shape index: {}]   ;;  %s700_s7 = inlined_call_operand.hbm [shape: f32[8,128], index: 7, kind: output, shape index: {}]  }
   0x1   :  { %v27_v0 = vld [vmem:[%s693_s0] sm:$0xff]  ;;  %v109_v1 = vld [vmem:[%s694_s1 + $0xf8] sm:$0xff]  ;;  %460 = vset.pattern.permute.xlu0 %v489_v2  ;;  %462 = vset.pattern.permute.xlu1 %v490_v3  ;;  %v108_v6 = vld [vmem:[%s694_s1 + $0xf0] sm:$0xff]  ;;  %v493_v15 = vmov 3  }
   0x2   :  { %v54_v4 = vadd.s32 128, %v27_v0  ;;  %v93_v5 = vld [vmem:[%s694_s1 + $0x78] sm:$0xff]  ;;  %32 = vperm.xlu0 %460, %v27_v0   ;;  %386 = vmatprep.subr.mxu0 %v109_v1  ;;  %v92_v7 = vld [vmem:[%s694_s1 + $0x70] sm:$0xff]  ;;  %v42_v8 = vadd.s32 64, %v27_v0  ;;  %v107_v9 = vld [vmem:[%s694_s1 + $0xe8] sm:$0xff]  ;;  %v66_v10 = vadd.s32 192, %v27_v0 }
   0x3   :  { %387 = vmatpush3.msra.mxu0 %v93_v5  ;;  %431 = vmatprep.subr.mxu1 %v491_v11  ;;  %v91_v12 = vld [vmem:[%s694_s1 + $0x68] sm:$0xff]  ;;  %v106_v14 = vld [vmem:[%s694_s1 + $0xe0] sm:$0xff]  ;;  %v105_v17 = vld [vmem:[%s694_s1 + $0xd8] sm:$0xff] }
   0x4   :  { %56 = vperm.xlu1 %462, %v54_v4   ;;  %388 = vmatprep.subr.mxu0 %v108_v6  ;;  %v90_v16 = vld [vmem:[%s694_s1 + $0x60] sm:$0xff]  ;;  %v89_v18 = vld [vmem:[%s694_s1 + $0x58] sm:$0xff]  ;;  %v104_v19 = vld [vmem:[%s694_s1 + $0xd0] sm:$0xff] }
   0x5   :  { %389 = vmatpush3.msra.mxu0 %v92_v7  ;;  %v88_v20 = vld [vmem:[%s694_s1 + $0x50] sm:$0xff] }
   0x6   :  { %461 = vset.pattern.permute.xlu0 %v492_v13  ;;  %390 = vmatprep.subr.mxu0 %v107_v9 }
   0x7   :  { %44 = vperm.xlu0 %461, %v42_v8   ;;  %391 = vmatpush3.msra.mxu0 %v91_v12 }
   0x8   :  { %463 = vset.pattern.permute.xlu1 %v493_v15  ;;  %392 = vmatprep.subr.mxu0 %v106_v14 }
   0x9   :  { %68 = vperm.xlu1 %463, %v66_v10   ;;  %393 = vmatpush3.msra.mxu0 %v90_v16 }
   0xa   :  { %394 = vmatprep.subr.mxu0 %v105_v17 }
   0xb   :  { %464 = vset.pattern.permute.xlu0 %v493_v15 }
   0xc   :  { %12 = vsyncpa [#allocation3], 0  ;;  %395 = vmatpush3.msra.mxu0 %v89_v18  ;;  %v103_v21 = vld [vmem:[%s694_s1 + $0xc8] sm:$0xff]  ;;  %v102_v23 = vld [vmem:[%s694_s1 + $0xc0] sm:$0xff]  ;;  %v28_v41 = vlaneseq  ;;  %vm494_vm8 = vmmov 0   ;;  %vm199_vm9 = vcmask 261120  }
   0xd   :  { %396 = vmatprep.subr.mxu0 %v104_v19  ;;  %v87_v22 = vld [vmem:[%s694_s1 + $0x48] sm:$0xff]  ;;  %v86_v24 = vld [vmem:[%s694_s1 + $0x40] sm:$0xff]  ;;  %v101_v25 = vld [vmem:[%s694_s1 + $0xb8] sm:$0xff]  ;;  %439 = vmatprep.mubr.msk.f32.mxu1 %vm494_vm8, %v491_v11  ;;  %s495_s13 = smov [#allocation2]  }
   0xe   :  { %397 = vmatpush3.msra.mxu0 %v88_v20  ;;  %v85_v26 = vld [vmem:[%s694_s1 + $0x38] sm:$0xff]  ;;  %v100_v27 = vld [vmem:[%s694_s1 + $0xb0] sm:$0xff]  ;;  %v99_v29 = vld [vmem:[%s694_s1 + $0xa8] sm:$0xff]  ;;  %v29_v42 = vand.u32 127, %v28_v41  ;;  %s365_s14 = sshll.u32 %s495_s13, 4  ;;  %s366_s14 = int_to_ptr.vmem [resolvable:$true] %s365_s14 }
   0xf   :  { %398 = vmatprep.subr.mxu0 %v103_v21  ;;  %v84_v28 = vld [vmem:[%s694_s1 + $0x30] sm:$0xff]  ;;  %v83_v30 = vld [vmem:[%s694_s1 + $0x28] sm:$0xff]  ;;  %v98_v31 = vld [vmem:[%s694_s1 + $0xa0] sm:$0xff]  ;;  %p472_p1 = scmp.lt.s32.totalorder %s366_s14, %s366_s14 }
  0x10   :  { %399 = vmatpush3.msra.mxu0 %v87_v22  ;;  %v82_v32 = vld [vmem:[%s694_s1 + $0x20] sm:$0xff]  ;;  %v97_v33 = vld [vmem:[%s694_s1 + $0x98] sm:$0xff]  ;;  %v96_v35 = vld [vmem:[%s694_s1 + $0x90] sm:$0xff]  ;;  %v30_v43 = vadd.s32 128, %v29_v42 }
  0x11   :  { %400 = vmatprep.subr.mxu0 %v102_v23  ;;  %v81_v34 = vld [vmem:[%s694_s1 + $0x18] sm:$0xff]  ;;  %v80_v36 = vld [vmem:[%s694_s1 + $0x10] sm:$0xff]  ;;  %v95_v37 = vld [vmem:[%s694_s1 + $0x88] sm:$0xff] }
  0x12   :  { %401 = vmatpush3.msra.mxu0 %v86_v24  ;;  %v79_v38 = vld [vmem:[%s694_s1 + $0x8] sm:$0xff]  ;;  %v94_v39 = vld [vmem:[%s694_s1 + $0x80] sm:$0xff]  ;;  %v191_v62 = vld [vmem:[%s696_s3 + $0x18] sm:$0xff] }
  0x13   :  { %402 = vmatprep.subr.mxu0 %v101_v25  ;;  %v78_v40 = vld [vmem:[%s694_s1] sm:$0xff]  ;;  %v190_v63 = vld [vmem:[%s696_s3 + $0x10] sm:$0xff]  ;;  %432 = vmatpush3.msra.mxu1 %v191_v62  ;;  %v189_v0 = vld [vmem:[%s696_s3 + $0x8] sm:$0xff] }
  0x14   :  { %403 = vmatpush3.msra.mxu0 %v85_v26  ;;  %433 = vmatprep.subr.mxu1 %v491_v11  ;;  %v188_v1 = vld [vmem:[%s696_s3] sm:$0xff]  ;;  %v277_v7 = vld [vmem:[%s698_s5 + $0x18] sm:$0xff]  ;;  %v276_v9 = vld [vmem:[%s698_s5 + $0x10] sm:$0xff] }
  0x15   :  { %404 = vmatprep.subr.mxu0 %v100_v27  ;;  %434 = vmatpush3.msra.mxu1 %v190_v63  ;;  %v381_v3 = vld [vmem:[%s695_s2] ss:$0 sm:$0xff]  ;;  %v275_v10 = vld [vmem:[%s698_s5 + $0x8] sm:$0xff] }
  0x16   :  { %405 = vmatpush3.msra.mxu0 %v84_v28  ;;  %435 = vmatprep.subr.mxu1 %v491_v11  ;;  %v274_v12 = vld [vmem:[%s698_s5] sm:$0xff]  ;;  %s467_s5 = scalar_lea.vmem %s366_s14, 128 }
  0x17   :  { %406 = vmatprep.subr.mxu0 %v99_v29  ;;  %436 = vmatpush3.msra.mxu1 %v189_v0  ;;  %v382_v13 = vld [vmem:[%s697_s4] ss:$0 sm:$0xff]  ;;  %p468_p0 = scmp.ne.s32.totalorder %s366_s14, %s467_s5  ;;  %p473_p2 = scmp.lt.s32.totalorder %s467_s5, %s467_s5 }
  0x18   :  { %407 = vmatpush3.msra.mxu0 %v83_v30  ;;  %437 = vmatprep.subr.mxu1 %v491_v11  ;;  %v384_v18 = vld [vmem:[%s699_s6] ss:$0 sm:$0xff] }
  0x19   :  { %408 = vmatprep.subr.mxu0 %v98_v31  ;;  %438 = vmatpush3.msra.mxu1 %v188_v1  ;;  %p474_p3 = por %p473_p2, %p472_p1 }
  0x1a   :  { %409 = vmatpush3.msra.mxu0 %v82_v32  ;;  %442 = vmatprep.subr.mxu1 %v491_v11 }
  0x1b   :  { %410 = vmatprep.subr.mxu0 %v97_v33  ;;  %p475_p4 = pnand %p474_p3, %p468_p0 }
  0x1c   :  { %411 = vmatpush3.msra.mxu0 %v81_v34 }
  0x1d   :  { %412 = vmatprep.subr.mxu0 %v96_v35 }
  0x1e   :  { %413 = vmatpush3.msra.mxu0 %v80_v36 }
  0x1f   :  { %414 = vmatprep.subr.mxu0 %v95_v37 }
  0x20   :  { %415 = vmatpush3.msra.mxu0 %v79_v38 }
  0x21   :  { %416 = vmatprep.subr.mxu0 %v94_v39 }
  0x22   :  { %417 = vmatpush3.msra.mxu0 %v78_v40 }
  0x7d   :  { %v33_v44 = vpop.permute.xlu0 %32 }
  0x7e   :  { %vm34_vm0 = vcmp.eq.s32.totalorder %v29_v42, %v33_v44  ;;  %vm35_vm1 = vcmp.eq.s32.totalorder %v30_v43, %v33_v44 }
  0x7f   :  { %v57_v45 = vpop.permute.xlu1 %56  ;;  %v373_v46 = vsel %vm34_vm0, 1.0, %v491_v11  ;;  %v374_v47 = vsel %vm35_vm1, 1.0, %v491_v11 }
  0x80   :  { %vm58_vm2 = vcmp.eq.s32.totalorder %v29_v42, %v57_v45  ;;  %vm59_vm3 = vcmp.eq.s32.totalorder %v30_v43, %v57_v45 }
  0x81   :  { %v377_v54 = vsel %vm58_vm2, 1.0, %v491_v11  ;;  %v378_v55 = vsel %vm59_vm3, 1.0, %v491_v11 }
  0x82   :  { %v45_v48 = vpop.permute.xlu0 %44 }
  0x83   :  { %vm46_vm4 = vcmp.eq.s32.totalorder %v29_v42, %v45_v48  ;;  %vm47_vm5 = vcmp.eq.s32.totalorder %v30_v43, %v45_v48 }
  0x84   :  { %v69_v49 = vpop.permute.xlu1 %68  ;;  %v375_v50 = vsel %vm46_vm4, 1.0, %v491_v11  ;;  %v376_v51 = vsel %vm47_vm5, 1.0, %v491_v11 }
  0x85   :  { %vm70_vm6 = vcmp.eq.s32.totalorder %v29_v42, %v69_v49  ;;  %vm71_vm7 = vcmp.eq.s32.totalorder %v30_v43, %v69_v49  ;;  %v52_v52 = vadd.f32 %v375_v50, %v373_v46  ;;  %v53_v53 = vadd.f32 %v376_v51, %v374_v47 }
  0x86   :  { %v379_v56 = vsel %vm70_vm6, 1.0, %v491_v11  ;;  %v380_v57 = vsel %vm71_vm7, 1.0, %v491_v11 }
  0x87   :  { %v64_v58 = vadd.f32 %v377_v54, %v52_v52  ;;  %v65_v59 = vadd.f32 %v378_v55, %v53_v53 }
  0x89   :  { %v76_v60 = vadd.f32 %v379_v56, %v64_v58  ;;  %v77_v61 = vadd.f32 %v380_v57, %v65_v59 }
  0x8b   :  { %181 = vmatprep.mubr.f32.mxu0 %v77_v61 }
  0x8c   :  { %182 = vmatmul.mubr.f32.vlgmr.msra.gmra.mxu0 %v76_v60 }
 0x14c   :  { %v418_v2 = vpop.f32.mrf.mxu0 }
 0x14e   :  { %v419_v4 = vpop.f32.mrf.mxu0 }
 0x14f   :  { %v420_v5 = vadd.f32 %v419_v4, %v418_v2 }
 0x151   :  { %v184_v6 = vadd.f32 %v420_v5, %v381_v3 }
 0x153   :  { %465 = vtanh.f32 %v184_v6 }
 0x160   :  { %v466_v8 = vpop.eup %465 }
 0x161   :  { %440 = vmatmul.mubr.msk.f32.vlgmr.msra.gmra.mxu1 %vm199_vm9, %v466_v8 }
 0x162   :  { %443 = vmatpush3.msra.mxu1 %v277_v7  ;;  %450 = vmatprep.mubr.msk.f32.mxu1 %vm494_vm8, %v491_v11 }
 0x163   :  { %444 = vmatprep.subr.mxu1 %v491_v11 }
 0x164   :  { %445 = vmatpush3.msra.mxu1 %v276_v9 }
 0x165   :  { %446 = vmatprep.subr.mxu1 %v491_v11 }
 0x166   :  { %447 = vmatpush3.msra.mxu1 %v275_v10 }
 0x167   :  { %448 = vmatprep.subr.mxu1 %v491_v11 }
 0x168   :  { %449 = vmatpush3.msra.mxu1 %v274_v12 }
 0x221   :  { %v269_v14 = vpop.f32.mrf.mxu1 }
 0x222   :  { %v270_v15 = vadd.f32 %v382_v13, %v269_v14 }
 0x223   :  { %v441_v16 = vpop.f32.mrf.mxu1 }
 0x224   :  { %v273_v17 = vmax.f32 %v270_v15, 0.0 }
 0x226   :  { %451 = vmatmul.mubr.msk.f32.vlgmr.msra.gmra.mxu1 %vm199_vm9, %v273_v17 }
 0x2e6   :  { %v354_v11 = vpop.f32.mrf.mxu1 }
 0x2e7   :  { %v355_v19 = vadd.f32 %v384_v18, %v354_v11 }
 0x2e8   :  { %v452_v20 = vpop.f32.mrf.mxu1 }
 0x2e9   :  { %358 = vst [vmem:[#allocation2] sm:$0xff] %v355_v19 }
 0x2ea   :  { %478 = shalt.err (!%p475_p4)
}
 0x2eb   :  { %368 = dma.vmem_to_hbm [thread:$0]  %s366_s14, 128, %s700_s7, [#allocation3]  }
 0x2ec   :  { %487 = dma.done.wait [#allocation3], 128  }
 0x2ed   :  { %488 = vsyncadd [#allocation3], 4294967168 }
 0x2ee   :  { %372 = vsyncpa [#allocation3], 1 }

</bundles_post_ra>
